<compile_context>
chip_gen: v7x
topology: tpu7x:2x2x1
jax: 0.10.0
libtpu: 0.0.40
codegen_flags: <defaults>
</compile_context>

<pallas_src>
import functools
import numpy as np
import jax
import jax.numpy as jnp
from jax.experimental import pallas as pl
from jax.experimental.pallas import tpu as pltpu


def _round_up(x, m):
    return ((x + m - 1) // m) * m


# ---------------------------------------------------------------------------
# Fused attention-gate Pallas kernel
# ---------------------------------------------------------------------------
def _attention_gate_kernel(x_ref, g_ref, wi_ref, wg_ref, wo_ref, b_ref,
                           shift_ref, o_ref):
    # x_ref    : (TM, Cxp) f32   skip-connection features (flattened pixels)
    # g_ref    : (TM, Cgp) f32   gating features (same pixels)
    # wi_ref   : (Cxp, Cip) bf16 input_conv weight  (1x1 conv == GEMM)
    # wg_ref   : (Cgp, Cip) bf16 gate_conv weight
    # wo_ref   : (1, Cip)  f32   output_conv weight, pre-scaled by folded BN scale
    # b_ref    : (1, Cip)  f32   input_conv.bias + gate_conv.bias
    # shift_ref: (1,)      f32   SMEM scalar: bo*bn_scale + bn_shift
    x = x_ref[...]

    # combined = relu(input_conv(x) + gate_conv(gate)) -- MXU GEMMs, f32 accumulate.
    acc = jnp.dot(x.astype(jnp.bfloat16), wi_ref[...],
                  preferred_element_type=jnp.float32)
    acc += jnp.dot(g_ref[...].astype(jnp.bfloat16), wg_ref[...],
                   preferred_element_type=jnp.float32)
    combined = jnp.maximum(acc + b_ref[...], 0.0)

    # output_conv (Ci -> 1) + BatchNorm(eval) + sigmoid, fused as a VPU multiply +
    # cross-lane (XLU) reduction instead of an N=1 MXU GEMM.
    logit = jnp.sum(combined * wo_ref[...], axis=-1, keepdims=True)
    att = jax.nn.sigmoid(logit + shift_ref[0])

    # Gate the skip features.
    o_ref[...] = (x * att).astype(o_ref.dtype)


@functools.lru_cache(maxsize=None)
def _get_attention_call(M, Cxp, Cgp, Cip):
    # Row tile: pad M only to the sublane multiple (8), cap at 256 rows, and keep
    # at least 2 grid blocks when possible so both v7x TensorCores get work.
    TM = min(256, _round_up(max(8, -(-M // 2)), 8))
    Mp = _round_up(M, TM)
    grid = (Mp // TM,)

    flops = 2 * Mp * Cip * (Cxp + Cgp) + 4 * Mp * Cip + 2 * Mp * Cxp
    bytes_accessed = (4 * Mp * (2 * Cxp + Cgp)          # x in, out, gate in (f32)
                      + 2 * Cip * (Cxp + Cgp)           # bf16 weights
                      + 4 * 2 * Cip + 4)                # wo, bias, shift

    call = pl.pallas_call(
        _attention_gate_kernel,
        out_shape=jax.ShapeDtypeStruct((Mp, Cxp), jnp.float32),
        grid=grid,
        in_specs=[
            pl.BlockSpec((TM, Cxp), lambda i: (i, 0)),   # x rows
            pl.BlockSpec((TM, Cgp), lambda i: (i, 0)),   # gate rows
            pl.BlockSpec((Cxp, Cip), lambda i: (0, 0)),  # Wi (resident)
            pl.BlockSpec((Cgp, Cip), lambda i: (0, 0)),  # Wg (resident)
            pl.BlockSpec((1, Cip), lambda i: (0, 0)),    # Wo * bn_scale
            pl.BlockSpec((1, Cip), lambda i: (0, 0)),    # bi + bg
            pl.BlockSpec(memory_space=pltpu.MemorySpace.SMEM),  # folded BN shift
        ],
        out_specs=pl.BlockSpec((TM, Cxp), lambda i: (i, 0)),
        compiler_params=pltpu.CompilerParams(
            dimension_semantics=("parallel",)),
        cost_estimate=pl.CostEstimate(flops=flops, transcendentals=Mp,
                                      bytes_accessed=bytes_accessed),
    )
    return call, TM, Mp


# ---------------------------------------------------------------------------
# Parameters: raw (PyTorch layout) + packed (kernel-ready, hoisted static prep)
# ---------------------------------------------------------------------------
def make_attention_params(gate_channels, in_channels, inter_channels, key):
    """Raw parameters in PyTorch layouts (Conv2d weight: (Cout, Cin, 1, 1))."""
    ks = jax.random.split(key, 8)

    def conv_w(k, cout, cin):
        bound = 1.0 / np.sqrt(cin)
        return jax.random.uniform(k, (cout, cin, 1, 1), jnp.float32, -bound, bound)

    def conv_b(k, cout, cin):
        bound = 1.0 / np.sqrt(cin)
        return jax.random.uniform(k, (cout,), jnp.float32, -bound, bound)

    return dict(
        wg=conv_w(ks[0], inter_channels, gate_channels),
        bg=conv_b(ks[1], inter_channels, gate_channels),
        wi=conv_w(ks[2], inter_channels, in_channels),
        bi=conv_b(ks[3], inter_channels, in_channels),
        wo=conv_w(ks[4], 1, inter_channels),
        bo=conv_b(ks[5], 1, inter_channels),
        # BatchNorm2d(1): eval-mode running stats (fresh module: mean=0, var=1).
        bn_gamma=1.0 + 0.05 * jax.random.normal(ks[6], (1,), jnp.float32),
        bn_beta=0.05 * jax.random.normal(ks[7], (1,), jnp.float32),
        bn_mean=jnp.zeros((1,), jnp.float32),
        bn_var=jnp.ones((1,), jnp.float32),
    )


def pack_attention_params(p, eps=1e-5):
    """Hoisted static weight prep: fold BN (eval), transpose 1x1 convs to GEMM
    layout, zero-pad channel dims to 128-lane multiples, pre-cast MXU operands to
    bf16."""
    Ci = p["wi"].shape[0]
    Cx = p["wi"].shape[1]
    Cg = p["wg"].shape[1]
    Cxp, Cgp, Cip = _round_up(Cx, 128), _round_up(Cg, 128), _round_up(Ci, 128)

    def pack_w(w, cin_p):  # (Ci, Cin, 1, 1) -> (Cin_p, Ci_p) bf16
        wm = jnp.transpose(w[:, :, 0, 0], (1, 0))
        wm = jnp.pad(wm, ((0, cin_p - wm.shape[0]), (0, Cip - Ci)))
        return wm.astype(jnp.bfloat16)

    s = p["bn_gamma"] / jnp.sqrt(p["bn_var"] + eps)          # BN scale
    t = p["bn_beta"] - p["bn_mean"] * s                      # BN shift
    wo = p["wo"][:, :, 0, 0]                                  # (1, Ci)
    wo_scaled = jnp.pad(wo * s[:, None], ((0, 0), (0, Cip - Ci)))
    bias = jnp.pad((p["bi"] + p["bg"]).reshape(1, Ci), ((0, 0), (0, Cip - Ci)))
    shift = (p["bo"] * s + t).reshape(1).astype(jnp.float32)

    return dict(
        wi=pack_w(p["wi"], Cxp),
        wg=pack_w(p["wg"], Cgp),
        wo=wo_scaled.astype(jnp.float32),
        bias=bias.astype(jnp.float32),
        shift=shift,
    )


# ---------------------------------------------------------------------------
# Forward (single jit: all padding / transposes fuse around one pallas_call)
# ---------------------------------------------------------------------------
@jax.jit
def attention_block_forward(x_nchw, gate_nchw, params):
    """Eval-mode AttentionBlock forward; x, gate are NCHW float32."""
    N, Cx, H, W = x_nchw.shape
    Ng, Cg, Hg, Wg = gate_nchw.shape
    if (Hg, Wg) != (H, W):
        # PyTorch resizes gate_conv(gate) bilinearly (align_corners=False); a 1x1
        # conv commutes with bilinear resampling, so resizing gate first is
        # mathematically identical and keeps everything in one fused kernel.
        gate_nchw = jax.image.resize(gate_nchw, (Ng, Cg, H, W), method="bilinear")

    M = N * H * W
    x2 = jnp.transpose(x_nchw, (0, 2, 3, 1)).reshape(M, Cx)
    g2 = jnp.transpose(gate_nchw, (0, 2, 3, 1)).reshape(M, Cg)

    Cxp = params["wi"].shape[0]
    Cgp = params["wg"].shape[0]
    Cip = params["wi"].shape[1]
    call, _, Mp = _get_attention_call(M, Cxp, Cgp, Cip)

    x_p = jnp.pad(x2, ((0, Mp - M), (0, Cxp - Cx)))
    g_p = jnp.pad(g2, ((0, Mp - M), (0, Cgp - Cg)))
    out = call(x_p, g_p, params["wi"], params["wg"], params["wo"],
               params["bias"], params["shift"])
    out = out[:M, :Cx].reshape(N, H, W, Cx)
    return jnp.transpose(out, (0, 3, 1, 2))


# ---------------------------------------------------------------------------
# Pure-JAX f32 reference (for correctness tolerance check)
# ---------------------------------------------------------------------------
@jax.jit
def attention_block_reference(x, gate, p, eps=1e-5):
    def conv1x1(inp, w, b):
        return jnp.einsum("nchw,oc->nohw", inp, w[:, :, 0, 0]) \
            + b[None, :, None, None]

    gc = conv1x1(gate, p["wg"], p["bg"])
    ic = conv1x1(x, p["wi"], p["bi"])
    if gc.shape[2:] != ic.shape[2:]:
        gc = jax.image.resize(gc, gc.shape[:2] + ic.shape[2:], method="bilinear")
    combined = jnp.maximum(gc + ic, 0.0)
    z = conv1x1(combined, p["wo"], p["bo"])
    s = p["bn_gamma"] / jnp.sqrt(p["bn_var"] + eps)
    z = z * s[None, :, None, None] \
        + (p["bn_beta"] - p["bn_mean"] * s)[None, :, None, None]
    return x * jax.nn.sigmoid(z)


if __name__ == "__main__":
    gate_channels, in_channels, inter_channels = 32, 64, 16
    N, H, W = 2, 16, 16

    key = jax.random.PRNGKey(0)
    kp, kx, kg = jax.random.split(key, 3)
    raw = make_attention_params(gate_channels, in_channels, inter_channels, kp)
    params = pack_attention_params(raw)

    x = jax.random.normal(kx, (N, in_channels, H, W), jnp.float32)
    gate = jax.random.normal(kg, (N, gate_channels, H, W), jnp.float32)

    out = jax.block_until_ready(attention_block_forward(x, gate, params))
    assert out.shape == (N, in_channels, H, W), out.shape
    assert bool(jnp.all(jnp.isfinite(out)))

    # Correctness vs f32 reference (bf16 MXU operands -> loose tolerance).
    ref = jax.block_until_ready(attention_block_reference(x, gate, raw))
    np.testing.assert_allclose(np.asarray(out), np.asarray(ref),
                               atol=1e-1, rtol=1e-2)

    # Exercise the spatial-mismatch (bilinear upsample) branch too.
    gate_small = jax.random.normal(jax.random.fold_in(key, 7),
                                   (N, gate_channels, H // 2, W // 2), jnp.float32)
    out2 = jax.block_until_ready(attention_block_forward(x, gate_small, params))
    assert out2.shape == (N, in_channels, H, W)
    assert bool(jnp.all(jnp.isfinite(out2)))

    print("KERNEL_OK")
</pallas_src>

<mosaic_0001>
module attributes {stable_mosaic.version = 11 : i64} {
  func.func @_attention_gate_kernel(%arg0: i32, %arg1: memref<256x128xf32, #tpu.memory_space<vmem>>, %arg2: memref<256x128xf32, #tpu.memory_space<vmem>>, %arg3: memref<128x128xbf16, #tpu.memory_space<vmem>>, %arg4: memref<128x128xbf16, #tpu.memory_space<vmem>>, %arg5: memref<1x128xf32, #tpu.memory_space<vmem>>, %arg6: memref<1x128xf32, #tpu.memory_space<vmem>>, %arg7: memref<1xf32, #tpu.memory_space<smem>>, %arg8: memref<256x128xf32, #tpu.memory_space<vmem>>) attributes {dimension_semantics = [#tpu.dimension_semantics<parallel>], iteration_bounds = array<i64: 2>, scalar_prefetch = 0 : i64, scratch_operands = 0 : i64, tpu.core_type = #tpu.core_type<tc>, window_params = [{transform_indices = @transform_0, window_bounds = array<i64: 256, 128>}, {transform_indices = @transform_1, window_bounds = array<i64: 256, 128>}, {pipeline_mode = #tpu.pipeline_mode<synchronous>, transform_indices = @transform_2, window_bounds = array<i64: 128, 128>}, {pipeline_mode = #tpu.pipeline_mode<synchronous>, transform_indices = @transform_3, window_bounds = array<i64: 128, 128>}, {pipeline_mode = #tpu.pipeline_mode<synchronous>, transform_indices = @transform_4, window_bounds = array<i64: 1, 128>}, {pipeline_mode = #tpu.pipeline_mode<synchronous>, transform_indices = @transform_5, window_bounds = array<i64: 1, 128>}, {transform_indices = @transform_6, window_bounds = array<i64: 1>}, {transform_indices = @transform_7, window_bounds = array<i64: 256, 128>}]} {
    %c0 = arith.constant 0 : index
    %c0_0 = arith.constant 0 : index
    %0 = vector.load %arg1[%c0, %c0_0] : memref<256x128xf32, #tpu.memory_space<vmem>>, vector<256x128xf32>
    %1 = arith.truncf %0 : vector<256x128xf32> to vector<256x128xbf16>
    %c0_1 = arith.constant 0 : index
    %c0_2 = arith.constant 0 : index
    %2 = vector.load %arg3[%c0_1, %c0_2] : memref<128x128xbf16, #tpu.memory_space<vmem>>, vector<128x128xbf16>
    %cst = arith.constant dense<0.000000e+00> : vector<256x128xf32>
    %3 = tpu.matmul %1, %2, %cst {dimension_numbers = #tpu.dot_dimension_numbers<[1], [0], [0], [1], [0, 0, 1, 1], [], []>} : vector<256x128xbf16>, vector<128x128xbf16>, vector<256x128xf32> -> vector<256x128xf32>
    %c0_3 = arith.constant 0 : index
    %c0_4 = arith.constant 0 : index
    %4 = vector.load %arg2[%c0_3, %c0_4] : memref<256x128xf32, #tpu.memory_space<vmem>>, vector<256x128xf32>
    %5 = arith.truncf %4 : vector<256x128xf32> to vector<256x128xbf16>
    %c0_5 = arith.constant 0 : index
    %c0_6 = arith.constant 0 : index
    %6 = vector.load %arg4[%c0_5, %c0_6] : memref<128x128xbf16, #tpu.memory_space<vmem>>, vector<128x128xbf16>
    %cst_7 = arith.constant dense<0.000000e+00> : vector<256x128xf32>
    %7 = tpu.matmul %5, %6, %cst_7 {dimension_numbers = #tpu.dot_dimension_numbers<[1], [0], [0], [1], [0, 0, 1, 1], [], []>} : vector<256x128xbf16>, vector<128x128xbf16>, vector<256x128xf32> -> vector<256x128xf32>
    %8 = arith.addf %3, %7 : vector<256x128xf32>
    %c0_8 = arith.constant 0 : index
    %c0_9 = arith.constant 0 : index
    %9 = vector.load %arg6[%c0_8, %c0_9] : memref<1x128xf32, #tpu.memory_space<vmem>>, vector<1x128xf32>
    %10 = vector.broadcast %9 : vector<1x128xf32> to vector<256x128xf32>
    %11 = arith.addf %8, %10 : vector<256x128xf32>
    %cst_10 = arith.constant 0.000000e+00 : f32
    %12 = vector.broadcast %cst_10 : f32 to vector<256x128xf32>
    %13 = arith.maximumf %11, %12 : vector<256x128xf32>
    %c0_11 = arith.constant 0 : index
    %c0_12 = arith.constant 0 : index
    %14 = vector.load %arg5[%c0_11, %c0_12] : memref<1x128xf32, #tpu.memory_space<vmem>>, vector<1x128xf32>
    %15 = vector.broadcast %14 : vector<1x128xf32> to vector<256x128xf32>
    %16 = arith.mulf %13, %15 : vector<256x128xf32>
    %cst_13 = arith.constant dense<0.000000e+00> : vector<256xf32>
    %17 = vector.multi_reduction <add>, %16, %cst_13 [1] : vector<256x128xf32> to vector<256xf32>
    %18 = vector.shape_cast %17 : vector<256xf32> to vector<256x1xf32>
    %c0_14 = arith.constant 0 : index
    %19 = memref.load %arg7[%c0_14] : memref<1xf32, #tpu.memory_space<smem>>
    %20 = vector.broadcast %19 : f32 to vector<256x1xf32>
    %21 = arith.addf %18, %20 : vector<256x1xf32>
    %22 = arith.negf %21 : vector<256x1xf32>
    %23 = math.exp %22 : vector<256x1xf32>
    %cst_15 = arith.constant 1.000000e+00 : f32
    %24 = vector.broadcast %cst_15 : f32 to vector<256x1xf32>
    %25 = arith.addf %24, %23 : vector<256x1xf32>
    %26 = arith.divf %24, %25 : vector<256x1xf32>
    %27 = vector.broadcast %26 : vector<256x1xf32> to vector<256x128xf32>
    %28 = arith.mulf %0, %27 : vector<256x128xf32>
    %c0_16 = arith.constant 0 : index
    %c0_17 = arith.constant 0 : index
    %29 = vector.load %arg8[%c0_16, %c0_17] : memref<256x128xf32, #tpu.memory_space<vmem>>, vector<256x128xf32>
    tpu.vector_store %arg8[%c0_16, %c0_17], %28 {strides = array<i32>} : memref<256x128xf32, #tpu.memory_space<vmem>>, vector<256x128xf32>,
    return
  }
  func.func @transform_0(%arg0: i32) -> (i32, i32) {
    %c0_i32 = arith.constant 0 : i32
    %c0_i32_0 = arith.constant 0 : i32
    return %arg0, %c0_i32 : i32, i32
  }
  func.func @transform_1(%arg0: i32) -> (i32, i32) {
    %c0_i32 = arith.constant 0 : i32
    %c0_i32_0 = arith.constant 0 : i32
    return %arg0, %c0_i32 : i32, i32
  }
  func.func @transform_2(%arg0: i32) -> (i32, i32) {
    %c0_i32 = arith.constant 0 : i32
    %c0_i32_0 = arith.constant 0 : i32
    %c0_i32_1 = arith.constant 0 : i32
    return %c0_i32, %c0_i32_0 : i32, i32
  }
  func.func @transform_3(%arg0: i32) -> (i32, i32) {
    %c0_i32 = arith.constant 0 : i32
    %c0_i32_0 = arith.constant 0 : i32
    %c0_i32_1 = arith.constant 0 : i32
    return %c0_i32, %c0_i32_0 : i32, i32
  }
  func.func @transform_4(%arg0: i32) -> (i32, i32) {
    %c0_i32 = arith.constant 0 : i32
    %c0_i32_0 = arith.constant 0 : i32
    %c0_i32_1 = arith.constant 0 : i32
    return %c0_i32, %c0_i32_0 : i32, i32
  }
  func.func @transform_5(%arg0: i32) -> (i32, i32) {
    %c0_i32 = arith.constant 0 : i32
    %c0_i32_0 = arith.constant 0 : i32
    %c0_i32_1 = arith.constant 0 : i32
    return %c0_i32, %c0_i32_0 : i32, i32
  }
  func.func @transform_6(%arg0: i32) -> i32 {
    %c0_i32 = arith.constant 0 : i32
    %c0_i32_0 = arith.constant 0 : i32
    return %c0_i32 : i32
  }
  func.func @transform_7(%arg0: i32) -> (i32, i32) {
    %c0_i32 = arith.constant 0 : i32
    %c0_i32_0 = arith.constant 0 : i32
    return %arg0, %c0_i32 : i32, i32
  }
}

</mosaic_0001>

<bundles_post_ra>
// kernel: attention_block_forward.1
= control target key start
LH: loop header
LB: loop body
LE: loop exit
PB: predicated region body
PF: predicated region fallthrough
CT: control target
= control target key end

     0   :  { %s2396_s0 = inlined_call_operand.vmem [shape: f32[512,128], index: 0, kind: input, shape index: {}]   ;;  %s2397_s1 = inlined_call_operand.vmem [shape: f32[512,128], index: 1, kind: input, shape index: {}]   ;;  %s2398_s2 = inlined_call_operand.vmem [shape: bf16[128,128], index: 2, kind: input, shape index: {}]   ;;  %s2399_s3 = inlined_call_operand.vmem [shape: bf16[128,128], index: 3, kind: input, shape index: {}]   ;;  %s2400_s4 = inlined_call_operand.vmem [shape: f32[1,128], index: 4, kind: input, shape index: {}]   ;;  %s2401_s5 = inlined_call_operand.vmem [shape: f32[1,128], index: 5, kind: input, shape index: {}]   ;;  %s2402_s6 = inlined_call_operand.<no memory space> [shape: f32[1], index: 6, kind: input, shape index: {}]   ;;  %s2403_s7 = inlined_call_operand.hbm [shape: f32[512,128], index: 7, kind: output, shape index: {}]  }
   0x1   :  { %12 = sst [smem:[#allocation2]] %s2402_s6 }
   0x2   :  { %13 = vsyncpa [#allocation4], 0 }
   0x3   :  { %15 = vsyncpa [#allocation4 + $0x1], 0  ;;  %s1957_s26 = smov 0   ;;  %s1959_s27 = smov 0  }
   0x4   :  { %s1961_s28 = smov 0   ;;  %s1963_s29 = smov 0  }
   0x5 LB: > { %s1978_s6 = sadd.s32 4294967295, %s1909_s29   ;;  %s1402_s30 = sadd.s32 4294967294, %s1909_s29   ;;  %s1909_s29 = sphi %s1963_s29, %s2409_s29   ;;  %s1905_s28 = sphi %s1961_s28, %s2408_s28   ;;  %s1901_s27 = sphi %s1959_s27, %s2407_s27   ;;  %s1897_s26 = sphi %s1957_s26, %s2406_s26  }
   0x6   : > { %s1982_s8 = sadd.s32 1, %s1909_s29   ;;  %s185_s9 = sadd.s32 1, %s1905_s28 }
   0x7   : > { %s182_s10 = ssub.s32 %s1909_s29, %s1982_s8  ;;  %p195_p0 = scmp.ne.s32.totalorder %s1905_s28, %s1901_s27 }
   0x8   : > { %p183_p1 = scmp.eq.s32.totalorder %s182_s10, 0  ;;  %p196_p2 = scmp.eq.s32.totalorder %s1978_s6, 1 }
   0x9   : > { %p201_p3 = scmp.ne.s32.totalorder %s1901_s27, %s1897_s26  ;;  %p202_p4 = scmp.eq.s32.totalorder %s1402_s30, 1 }
   0xa   : > { %s1993_s11 = scalar_select %p183_p1, %s1905_s28, %s185_s9  }
   0xb   : > { %p1995_p5 = por %p196_p2, %p195_p0  ;;  %p1999_p6 = por %p202_p4, %p201_p3 }
   0xc   : > { %p1405_p7 = scmp.ge.s32.totalorder %s1909_s29, 1  ;;  %p253_p8 = scmp.lt.s32.totalorder %s1909_s29, 3 }
   0xe   : > { %p254_p9 = pnand %p1405_p7, %p253_p8 }
   0xf   : > { %v1684_v0 = vld [vmem:[%s2399_s3] sm:$0xff] (!%p254_p9)   ;;  %s1407_s16 = sshll.u32 (!%p254_p9), %s1978_s6, 5  ;;  %v1686_v2 = vld [vmem:[%s2399_s3 + $0x8] sm:$0xff] (!%p254_p9)   ;;  %v1688_v4 = vld [vmem:[%s2399_s3 + $0x10] sm:$0xff] (!%p254_p9)   ;;  %s1024_s14 = sld [smem:[#allocation2]] (!%p254_p9) }
  0x10   : > { %257 = sbr.rel (%p254_p9) target bundleno = 522 (0x20a), region = 48  ;;  %v1685_v1 = vld [vmem:[%s2398_s2] sm:$0xff] (!%p254_p9)   ;;  %1515 = vmatprep.subr.bf16.mxu1 (!%p254_p9), %v1684_v0  ;;  %p291_p10 = scmp.lt.s32.totalorder (!%p254_p9), %s1407_s16, 63  ;;  %v1687_v3 = vld [vmem:[%s2398_s2 + $0x8] sm:$0xff] (!%p254_p9)   ;;  %v1689_v5 = vld [vmem:[%s2398_s2 + $0x10] sm:$0xff] (!%p254_p9)  }
  0x11   : > { %1563 = vmatprep.subr.bf16.mxu0 (!%p254_p9), %v1685_v1  ;;  %1516 = vmatpush3.bf16.msra.mxu1 (!%p254_p9), %v1684_v0  ;;  %v1690_v6 = vld [vmem:[%s2399_s3 + $0x18] sm:$0xff] (!%p254_p9)   ;;  %v1692_v8 = vld [vmem:[%s2399_s3 + $0x20] sm:$0xff] (!%p254_p9)   ;;  %v1694_v10 = vld [vmem:[%s2399_s3 + $0x28] sm:$0xff] (!%p254_p9)   ;;  %s287_s15 = sand.u32 (!%p254_p9), 1, %s1901_s27   ;;  %s1466_s19 = sshll.u32 (!%p254_p9), %s1978_s6, 12 }
  0x12   : > { %1564 = vmatpush3.bf16.msra.mxu0 (!%p254_p9), %v1685_v1  ;;  %1517 = vmatprep.subr.bf16.mxu1 (!%p254_p9), %v1686_v2  ;;  %v1691_v7 = vld [vmem:[%s2398_s2 + $0x18] sm:$0xff] (!%p254_p9)   ;;  %v1693_v9 = vld [vmem:[%s2398_s2 + $0x20] sm:$0xff] (!%p254_p9)   ;;  %v1695_v14 = vld [vmem:[%s2398_s2 + $0x28] sm:$0xff] (!%p254_p9)   ;;  %s2346_s23 = scalar_lea.hbm (!%p254_p9), %s2403_s7, %s1466_s19  ;;  %s2355_s6 = scalar_lea.sflag (!%p254_p9), [#allocation4], %s287_s15 }
  0x13   : > { %1565 = vmatprep.subr.bf16.mxu0 (!%p254_p9), %v1687_v3  ;;  %v1696_v18 = vld [vmem:[%s2399_s3 + $0x30] sm:$0xff] (!%p254_p9)   ;;  %v1698_v20 = vld [vmem:[%s2399_s3 + $0x38] sm:$0xff] (!%p254_p9)   ;;  %s1911_s30 = smov (!%p254_p9), [#allocation3]  }
  0x14   : > { %v1697_v19 = vld [vmem:[%s2398_s2 + $0x30] sm:$0xff] (!%p254_p9)   ;;  %v1699_v21 = vld [vmem:[%s2398_s2 + $0x38] sm:$0xff] (!%p254_p9)   ;;  %s1851_s9 = sshll.u32 (!%p254_p9), %s1911_s30, 4  ;;  %s1852_s9 = int_to_ptr.vmem [resolvable:$false] %s1851_s9 }
  0x15   : > { %1518 = vmatpush3.bf16.msra.mxu1 (!%p254_p9), %v1686_v2 }
  0x16   : > { %1566 = vmatpush3.bf16.msra.mxu0 (!%p254_p9), %v1687_v3  ;;  %1519 = vmatprep.subr.bf16.mxu1 (!%p254_p9), %v1688_v4 }
  0x17   : > { %s2411_s16 = smov (!%p291_p10, %s1407_s16), 63  ;;  %1567 = vmatprep.subr.bf16.mxu0 %v1689_v5 }
  0x18   : > { %s1408_s17 = sshll.u32 %s2411_s16, 3 }
  0x19   : > { %1520 = vmatpush3.bf16.msra.mxu1 %v1688_v4  ;;  %s2039_s24 = scalar_lea.vmem %s2397_s1, %s1408_s17  ;;  %s2044_s16 = scalar_lea.vmem %s2396_s0, %s1408_s17 }
  0x1a   : > { %1568 = vmatpush3.bf16.msra.mxu0 %v1689_v5  ;;  %1521 = vmatprep.subr.bf16.mxu1 %v1690_v6  ;;  %v368_v11 = vld [vmem:[%s2039_s24] sm:$0xff]  ;;  %v369_v12 = vld [vmem:[%s2039_s24 + $0x8] sm:$0xff]  ;;  %v370_v22 = vld [vmem:[%s2039_s24 + $0x10] sm:$0xff]  ;;  %s1406_s17 = sshll.u32 %s287_s15, 8 }
  0x1b   : > { %1569 = vmatprep.subr.bf16.mxu0 %v1691_v7  ;;  %v2052_v13 = vld [vmem:[%s2044_s16] sm:$0xff]  ;;  %v400_v15 = vpack.c.bf16 %v369_v12, %v368_v11  ;;  %v2058_v16 = vld [vmem:[%s2044_s16 + $0x8] sm:$0xff]  ;;  %v371_v23 = vld [vmem:[%s2039_s24 + $0x18] sm:$0xff]  ;;  %s2263_s18 = scalar_lea.vmem [#allocation3], %s1406_s17 }
  0x1c   : > { %v336_v17 = vpack.c.bf16 %v2058_v16, %v2052_v13  ;;  %v2077_v24 = vld [vmem:[%s2044_s16 + $0x10] sm:$0xff]  ;;  %v2080_v25 = vld [vmem:[%s2044_s16 + $0x18] sm:$0xff]  ;;  %v372_v26 = vld [vmem:[%s2039_s24 + $0x20] sm:$0xff]  ;;  %v401_v30 = vpack.c.bf16 %v371_v23, %v370_v22  ;;  %s1328_s20 = sshll.u32 %s2263_s18, 4  ;;  %s2348_s20 = int_to_ptr.vmem [resolvable:$true] %s1328_s20 }
  0x1d   : > { %1522 = vmatpush3.bf16.msra.mxu1 %v1690_v6  ;;  %1531 = vmatprep.mubr.bf16.mxu1 %v400_v15  ;;  %v373_v27 = vld [vmem:[%s2039_s24 + $0x28] sm:$0xff]  ;;  %v2085_v28 = vld [vmem:[%s2044_s16 + $0x20] sm:$0xff]  ;;  %v337_v31 = vpack.c.bf16 %v2080_v25, %v2077_v24  ;;  %v374_v34 = vld [vmem:[%s2039_s24 + $0x30] sm:$0xff]  ;;  %s1847_s25 = scalar_lea.vmem %s2348_s20, 4096  ;;  %p1854_p0 = scmp.lt.s32.totalorder %s2348_s20, %s1852_s9 }
  0x1e   : > { %1570 = vmatpush3.bf16.msra.mxu0 %v1691_v7  ;;  %1523 = vmatprep.subr.bf16.mxu1 %v1692_v8  ;;  %v2088_v29 = vld [vmem:[%s2044_s16 + $0x28] sm:$0xff]  ;;  %v402_v32 = vpack.c.bf16 %v373_v27, %v372_v26  ;;  %v375_v35 = vld [vmem:[%s2039_s24 + $0x38] sm:$0xff]  ;;  %v2097_v36 = vld [vmem:[%s2044_s16 + $0x30] sm:$0xff]  ;;  %p1848_p11 = scmp.ne.s32.totalorder %s2348_s20, %s1847_s25 }
  0x1f   : > { %1571 = vmatprep.subr.bf16.mxu0 %v1693_v9  ;;  %1579 = vmatprep.mubr.bf16.mxu0 %v336_v17  ;;  %v338_v33 = vpack.c.bf16 %v2088_v29, %v2085_v28  ;;  %v2100_v37 = vld [vmem:[%s2044_s16 + $0x38] sm:$0xff]  ;;  %v376_v38 = vld [vmem:[%s2039_s24 + $0x40] sm:$0xff]  ;;  %v377_v39 = vld [vmem:[%s2039_s24 + $0x48] sm:$0xff]  ;;  %v403_v42 = vpack.c.bf16 %v375_v35, %v374_v34 }
  0x20   : > { %v2105_v40 = vld [vmem:[%s2044_s16 + $0x40] sm:$0xff]  ;;  %v313_v41 = vld [vmem:[%s2044_s16 + $0x48] sm:$0xff]  ;;  %v339_v43 = vpack.c.bf16 %v2100_v37, %v2097_v36  ;;  %v404_v44 = vpack.c.bf16 %v377_v39, %v376_v38  ;;  %v378_v46 = vld [vmem:[%s2039_s24 + $0x50] sm:$0xff]  ;;  %p1849_p12 = pnand %p1848_p11, %p1995_p5 }
  0x21   : > { %1524 = vmatpush3.bf16.msra.mxu1 %v1692_v8  ;;  %v340_v45 = vpack.c.bf16 %v313_v41, %v2105_v40  ;;  %v379_v47 = vld [vmem:[%s2039_s24 + $0x58] sm:$0xff]  ;;  %v2114_v48 = vld [vmem:[%s2044_s16 + $0x50] sm:$0xff]  ;;  %v380_v50 = vld [vmem:[%s2039_s24 + $0x60] sm:$0xff] }
  0x22   : > { %1572 = vmatpush3.bf16.msra.mxu0 %v1693_v9  ;;  %1525 = vmatprep.subr.bf16.mxu1 %v1694_v10  ;;  %v2117_v49 = vld [vmem:[%s2044_s16 + $0x58] sm:$0xff]  ;;  %v381_v51 = vld [vmem:[%s2039_s24 + $0x68] sm:$0xff]  ;;  %v316_v52 = vld [vmem:[%s2044_s16 + $0x60] sm:$0xff]  ;;  %v405_v54 = vpack.c.bf16 %v379_v47, %v378_v46  ;;  %p1850_p13 = pneg %p1849_p12 }
  0x23   : > { %1573 = vmatprep.subr.bf16.mxu0 %v1695_v14  ;;  %v317_v53 = vld [vmem:[%s2044_s16 + $0x68] sm:$0xff]  ;;  %v341_v55 = vpack.c.bf16 %v2117_v49, %v2114_v48  ;;  %v406_v56 = vpack.c.bf16 %v381_v51, %v380_v50  ;;  %v382_v58 = vld [vmem:[%s2039_s24 + $0x70] sm:$0xff]  ;;  %v383_v59 = vld [vmem:[%s2039_s24 + $0x78] sm:$0xff] }
  0x24   : > { %v342_v57 = vpack.c.bf16 %v317_v53, %v316_v52  ;;  %v2128_v60 = vld [vmem:[%s2044_s16 + $0x70] sm:$0xff]  ;;  %v2131_v61 = vld [vmem:[%s2044_s16 + $0x78] sm:$0xff]  ;;  %v384_v62 = vld [vmem:[%s2039_s24 + $0x80] sm:$0xff]  ;;  %v407_v2 = vpack.c.bf16 %v383_v59, %v382_v58 }
  0x25   : > { %1526 = vmatpush3.bf16.msra.mxu1 %v1694_v10  ;;  %v385_v63 = vld [vmem:[%s2039_s24 + $0x88] sm:$0xff]  ;;  %v320_v0 = vld [vmem:[%s2044_s16 + $0x80] sm:$0xff]  ;;  %v343_v3 = vpack.c.bf16 %v2131_v61, %v2128_v60  ;;  %v386_v6 = vld [vmem:[%s2039_s24 + $0x90] sm:$0xff] }
  0x26   : > { %1574 = vmatpush3.bf16.msra.mxu0 %v1695_v14  ;;  %1527 = vmatprep.subr.bf16.mxu1 %v1696_v18  ;;  %v321_v1 = vld [vmem:[%s2044_s16 + $0x88] sm:$0xff]  ;;  %v408_v4 = vpack.c.bf16 %v385_v63, %v384_v62  ;;  %v387_v7 = vld [vmem:[%s2039_s24 + $0x98] sm:$0xff]  ;;  %v322_v8 = vld [vmem:[%s2044_s16 + $0x90] sm:$0xff] }
  0x27   : > { %1575 = vmatprep.subr.bf16.mxu0 %v1697_v19  ;;  %v344_v5 = vpack.c.bf16 %v321_v1, %v320_v0  ;;  %v323_v9 = vld [vmem:[%s2044_s16 + $0x98] sm:$0xff]  ;;  %v388_v10 = vld [vmem:[%s2039_s24 + $0xa0] sm:$0xff]  ;;  %v389_v11 = vld [vmem:[%s2039_s24 + $0xa8] sm:$0xff]  ;;  %v409_v15 = vpack.c.bf16 %v387_v7, %v386_v6 }
  0x28   : > { %v324_v12 = vld [vmem:[%s2044_s16 + $0xa0] sm:$0xff]  ;;  %v325_v14 = vld [vmem:[%s2044_s16 + $0xa8] sm:$0xff]  ;;  %v345_v17 = vpack.c.bf16 %v323_v9, %v322_v8  ;;  %v326_v22 = vld [vmem:[%s2044_s16 + $0xb0] sm:$0xff] }
  0x29   : > { %1528 = vmatpush3.bf16.msra.mxu1 %v1696_v18  ;;  %v410_v18 = vpack.c.bf16 %v389_v11, %v388_v10  ;;  %v327_v23 = vld [vmem:[%s2044_s16 + $0xb8] sm:$0xff]  ;;  %v392_v26 = vld [vmem:[%s2039_s24 + $0xc0] sm:$0xff]  ;;  %v393_v27 = vld [vmem:[%s2039_s24 + $0xc8] sm:$0xff] }
  0x2a   : > { %1576 = vmatpush3.bf16.msra.mxu0 %v1697_v19  ;;  %1529 = vmatprep.subr.bf16.mxu1 %v1698_v20  ;;  %v346_v19 = vpack.c.bf16 %v325_v14, %v324_v12  ;;  %v412_v34 = vpack.c.bf16 %v393_v27, %v392_v26  ;;  %v394_v38 = vld [vmem:[%s2039_s24 + $0xd0] sm:$0xff]  ;;  %v395_v39 = vld [vmem:[%s2039_s24 + $0xd8] sm:$0xff]  ;;  %v333_v46 = vld [vmem:[%s2044_s16 + $0xe8] sm:$0xff] }
  0x2b   : > { %1577 = vmatprep.subr.bf16.mxu0 %v1699_v21  ;;  %v330_v41 = vld [vmem:[%s2044_s16 + $0xd0] sm:$0xff]  ;;  %v413_v47 = vpack.c.bf16 %v395_v39, %v394_v38  ;;  %v2170_v0 = vld [vmem:[%s2401_s5] ss:$0 sm:$0xff] }
  0x2c   : > { %v398_v53 = vld [vmem:[%s2039_s24 + $0xf0] sm:$0xff]  ;;  %v2176_v11 = vld [vmem:[%s2400_s4] ss:$0 sm:$0xff] }
  0x2d   : > { %1530 = vmatpush3.bf16.msra.mxu1 %v1698_v20  ;;  %v390_v20 = vld [vmem:[%s2039_s24 + $0xb0] sm:$0xff] }
  0x2e   : > { %1578 = vmatpush3.bf16.msra.mxu0 %v1699_v21  ;;  %v391_v21 = vld [vmem:[%s2039_s24 + $0xb8] sm:$0xff] }
  0x30   : > { %1532 = vmatmul.mubr.bf16.vlgmr.msra.gmra.mrb[0].mxu1 %v401_v30  ;;  %v328_v30 = vld [vmem:[%s2044_s16 + $0xc0] sm:$0xff] }
  0x31   : > { %1580 = vmatmul.mubr.bf16.vlgmr.msra.gmra.mrb[0].mxu0 %v337_v31  ;;  %1535 = vmatprep.mubr.bf16.mxu1 %v402_v32  ;;  %v329_v31 = vld [vmem:[%s2044_s16 + $0xc8] sm:$0xff]  ;;  %v411_v32 = vpack.c.bf16 %v391_v21, %v390_v20 }
  0x32   : > { %1583 = vmatprep.mubr.bf16.mxu0 %v338_v33  ;;  %v347_v33 = vpack.c.bf16 %v327_v23, %v326_v22  ;;  %v348_v35 = vpack.c.bf16 %v329_v31, %v328_v30 }
  0x38   : > { %1536 = vmatmul.mubr.bf16.gmra.mrb[4].mxu1 %v403_v42  ;;  %v331_v42 = vld [vmem:[%s2044_s16 + $0xd8] sm:$0xff] }
  0x39   : > { %1584 = vmatmul.mubr.bf16.gmra.mrb[4].mxu0 %v339_v43  ;;  %1539 = vmatprep.mubr.bf16.mxu1 %v404_v44  ;;  %v396_v43 = vld [vmem:[%s2039_s24 + $0xe0] sm:$0xff]  ;;  %v397_v44 = vld [vmem:[%s2039_s24 + $0xe8] sm:$0xff]  ;;  %v349_v50 = vpack.c.bf16 %v331_v42, %v330_v41 }
  0x3a   : > { %1587 = vmatprep.mubr.bf16.mxu0 %v340_v45  ;;  %v332_v45 = vld [vmem:[%s2044_s16 + $0xe0] sm:$0xff]  ;;  %v414_v51 = vpack.c.bf16 %v397_v44, %v396_v43 }
  0x3b   : > { %v350_v52 = vpack.c.bf16 %v333_v46, %v332_v45 }
  0x40   : > { %1540 = vmatmul.mubr.bf16.gmra.mrb[8].mxu1 %v405_v54  ;;  %v399_v54 = vld [vmem:[%s2039_s24 + $0xf8] sm:$0xff]  ;;  %s1853_s24 = scalar_lea.vmem %s1852_s9, 8192 }
  0x41   : > { %1588 = vmatmul.mubr.bf16.gmra.mrb[8].mxu0 %v341_v55  ;;  %1543 = vmatprep.mubr.bf16.mxu1 %v406_v56  ;;  %v334_v55 = vld [vmem:[%s2044_s16 + $0xf0] sm:$0xff]  ;;  %v335_v56 = vld [vmem:[%s2044_s16 + $0xf8] sm:$0xff]  ;;  %p1855_p1 = scmp.lt.s32.totalorder %s1853_s24, %s1847_s25 }
  0x42   : > { %1591 = vmatprep.mubr.bf16.mxu0 %v342_v57  ;;  %v415_v57 = vpack.c.bf16 %v399_v54, %v398_v53  ;;  %v351_v58 = vpack.c.bf16 %v335_v56, %v334_v55 }
  0x43   : > { %p1856_p2 = por %p1855_p1, %p1854_p0 }
  0x45   : > { %p1857_p3 = pnand %p1856_p2, %p1850_p13 }
  0x48   : > { %1544 = vmatmul.mubr.bf16.gmra.mrb[12].mxu1 %v407_v2 }
  0x49   : > { %1592 = vmatmul.mubr.bf16.gmra.mrb[12].mxu0 %v343_v3  ;;  %1547 = vmatprep.mubr.bf16.mxu1 %v408_v4 }
  0x4a   : > { %1595 = vmatprep.mubr.bf16.mxu0 %v344_v5 }
  0x50   : > { %1548 = vmatmul.mubr.bf16.gmra.mrb[16].mxu1 %v409_v15 }
  0x51   : > { %1596 = vmatmul.mubr.bf16.gmra.mrb[16].mxu0 %v345_v17  ;;  %1551 = vmatprep.mubr.bf16.mxu1 %v410_v18 }
  0x52   : > { %1599 = vmatprep.mubr.bf16.mxu0 %v346_v19 }
  0x58   : > { %1552 = vmatmul.mubr.bf16.gmra.mrb[20].mxu1 %v411_v32 }
  0x59   : > { %1600 = vmatmul.mubr.bf16.gmra.mrb[20].mxu0 %v347_v33  ;;  %1555 = vmatprep.mubr.bf16.mxu1 %v412_v34 }
  0x5a   : > { %1603 = vmatprep.mubr.bf16.mxu0 %v348_v35 }
  0x60   : > { %1556 = vmatmul.mubr.bf16.gmra.mrb[24].mxu1 %v413_v47 }
  0x61   : > { %1604 = vmatmul.mubr.bf16.gmra.mrb[24].mxu0 %v349_v50  ;;  %1559 = vmatprep.mubr.bf16.mxu1 %v414_v51 }
  0x62   : > { %1607 = vmatprep.mubr.bf16.mxu0 %v350_v52 }
  0x68   : > { %1560 = vmatmul.mubr.bf16.gmra.mrb[28].mxu1 %v415_v57 }
  0x69   : > { %1608 = vmatmul.mubr.bf16.gmra.mrb[28].mxu0 %v351_v58 }
 0x103   : > { %v1533_v59 = vpop.f32.mrb[0].mxu1 }
 0x104   : > { %v1581_v62 = vpop.f32.mrb[0].mxu0  ;;  %v514_v63 = vpop.f32.mrb[1].mxu1 }
 0x105   : > { %v732_v1 = vadd.f32 %v1581_v62, %v1533_v59  ;;  %v723_v2 = vpop.f32.mrb[1].mxu0  ;;  %v1534_v3 = vpop.f32.mrb[2].mxu1 }
 0x106   : > { %v724_v4 = vadd.f32 %v723_v2, %v514_v63  ;;  %v1582_v5 = vpop.f32.mrb[2].mxu0  ;;  %v517_v6 = vpop.f32.mrb[3].mxu1 }
 0x107   : > { %v735_v7 = vadd.f32 %v1582_v5, %v1534_v3  ;;  %v726_v8 = vpop.f32.mrb[3].mxu0  ;;  %v859_v9 = vadd.f32 %v2170_v0, %v732_v1 }
 0x108   : > { %v727_v10 = vadd.f32 %v726_v8, %v517_v6  ;;  %v857_v12 = vadd.f32 %v2170_v0, %v724_v4 }
 0x109   : > { %v860_v14 = vadd.f32 %v2170_v0, %v735_v7  ;;  %v891_v15 = vmax.f32 %v859_v9, 0.0 }
 0x10a   : > { %v858_v17 = vadd.f32 %v2170_v0, %v727_v10  ;;  %v889_v18 = vmax.f32 %v857_v12, 0.0 }
 0x10b   : > { %v892_v19 = vmax.f32 %v860_v14, 0.0  ;;  %v1537_v20 = vpop.f32.mrb[4].mxu1  ;;  %v930_v21 = vmul.f32 %v2176_v11, %v891_v15 }
 0x10c   : > { %v890_v22 = vmax.f32 %v858_v17, 0.0  ;;  %v1585_v23 = vpop.f32.mrb[4].mxu0  ;;  %v530_v26 = vpop.f32.mrb[5].mxu1  ;;  %v928_v27 = vmul.f32 %v2176_v11, %v889_v18 }
 0x10d   : > { %v748_v30 = vadd.f32 %v1585_v23, %v1537_v20  ;;  %964 = vadd.xlane.f32.xlu1 %v930_v21  ;;  %v739_v31 = vpop.f32.mrb[5].mxu0  ;;  %v1538_v32 = vpop.f32.mrb[6].mxu1  ;;  %v931_v42 = vmul.f32 %v2176_v11, %v892_v19 }
 0x10e   : > { %v740_v33 = vadd.f32 %v739_v31, %v530_v26  ;;  %v1586_v34 = vpop.f32.mrb[6].mxu0  ;;  %960 = vadd.xlane.f32.xlu0 %v928_v27  ;;  %v533_v35 = vpop.f32.mrb[7].mxu1  ;;  %v929_v45 = vmul.f32 %v2176_v11, %v890_v22 }
 0x10f   : > { %v863_v38 = vadd.f32 %v2170_v0, %v748_v30  ;;  %v751_v39 = vadd.f32 %v1586_v34, %v1538_v32  ;;  %v742_v41 = vpop.f32.mrb[7].mxu0 }
 0x110   : > { %v861_v43 = vadd.f32 %v2170_v0, %v740_v33  ;;  %v743_v44 = vadd.f32 %v742_v41, %v533_v35 }
 0x111   : > { %v895_v46 = vmax.f32 %v863_v38, 0.0  ;;  %v864_v47 = vadd.f32 %v2170_v0, %v751_v39  ;;  %966 = vadd.xlane.f32.xlu1 %v931_v42 }
 0x112   : > { %v862_v50 = vadd.f32 %v2170_v0, %v743_v44  ;;  %962 = vadd.xlane.f32.xlu0 %v929_v45  ;;  %v893_v54 = vmax.f32 %v861_v43, 0.0 }
 0x113   : > { %v896_v51 = vmax.f32 %v864_v47, 0.0  ;;  %v1541_v52 = vpop.f32.mrb[8].mxu1  ;;  %v934_v53 = vmul.f32 %v2176_v11, %v895_v46 }
 0x114   : > { %v1589_v55 = vpop.f32.mrb[8].mxu0  ;;  %v546_v56 = vpop.f32.mrb[9].mxu1  ;;  %v894_v57 = vmax.f32 %v862_v50, 0.0  ;;  %v932_v9 = vmul.f32 %v2176_v11, %v893_v54 }
 0x115   : > { %v764_v58 = vadd.f32 %v1589_v55, %v1541_v52  ;;  %v755_v59 = vpop.f32.mrb[9].mxu0  ;;  %v1542_v62 = vpop.f32.mrb[10].mxu1  ;;  %v935_v63 = vmul.f32 %v2176_v11, %v896_v51 }
 0x116   : > { %v756_v1 = vadd.f32 %v755_v59, %v546_v56  ;;  %v1590_v2 = vpop.f32.mrb[10].mxu0  ;;  %972 = vadd.xlane.f32.xlu0 %v934_v53  ;;  %v549_v3 = vpop.f32.mrb[11].mxu1  ;;  %v933_v14 = vmul.f32 %v2176_v11, %v894_v57 }
 0x117   : > { %v867_v4 = vadd.f32 %v2170_v0, %v764_v58  ;;  %v767_v5 = vadd.f32 %v1590_v2, %v1542_v62  ;;  %974 = vadd.xlane.f32.xlu1 %v935_v63  ;;  %v758_v6 = vpop.f32.mrb[11].mxu0 }
 0x118   : > { %v865_v7 = vadd.f32 %v2170_v0, %v756_v1  ;;  %v759_v8 = vadd.f32 %v758_v6, %v549_v3 }
 0x119   : > { %v899_v10 = vmax.f32 %v867_v4, 0.0  ;;  %v868_v12 = vadd.f32 %v2170_v0, %v767_v5 }
 0x11a   : > { %v866_v15 = vadd.f32 %v2170_v0, %v759_v8  ;;  %968 = vadd.xlane.f32.xlu0 %v932_v9  ;;  %v897_v20 = vmax.f32 %v865_v7, 0.0 }
 0x11b   : > { %v900_v17 = vmax.f32 %v868_v12, 0.0  ;;  %970 = vadd.xlane.f32.xlu1 %v933_v14  ;;  %v1545_v18 = vpop.f32.mrb[12].mxu1  ;;  %v938_v19 = vmul.f32 %v2176_v11, %v899_v10 }
 0x11c   : > { %v1593_v21 = vpop.f32.mrb[12].mxu0  ;;  %v562_v22 = vpop.f32.mrb[13].mxu1  ;;  %v898_v23 = vmax.f32 %v866_v15, 0.0  ;;  %v936_v43 = vmul.f32 %v2176_v11, %v897_v20 }
 0x11d   : > { %v780_v26 = vadd.f32 %v1593_v21, %v1545_v18  ;;  %v771_v27 = vpop.f32.mrb[13].mxu0  ;;  %v1546_v30 = vpop.f32.mrb[14].mxu1  ;;  %v939_v31 = vmul.f32 %v2176_v11, %v900_v17 }
 0x11e   : > { %v772_v32 = vadd.f32 %v771_v27, %v562_v22  ;;  %v1594_v33 = vpop.f32.mrb[14].mxu0  ;;  %980 = vadd.xlane.f32.xlu0 %v938_v19  ;;  %v565_v34 = vpop.f32.mrb[15].mxu1  ;;  %v937_v46 = vmul.f32 %v2176_v11, %v898_v23 }
 0x11f   : > { %v871_v35 = vadd.f32 %v2170_v0, %v780_v26  ;;  %v783_v38 = vadd.f32 %v1594_v33, %v1546_v30  ;;  %v774_v39 = vpop.f32.mrb[15].mxu0  ;;  %982 = vadd.xlane.f32.xlu1 %v939_v31 }
 0x120   : > { %v869_v41 = vadd.f32 %v2170_v0, %v772_v32  ;;  %v775_v42 = vadd.f32 %v774_v39, %v565_v34 }
 0x121   : > { %v903_v44 = vmax.f32 %v871_v35, 0.0  ;;  %v872_v45 = vadd.f32 %v2170_v0, %v783_v38 }
 0x122   : > { %v870_v47 = vadd.f32 %v2170_v0, %v775_v42  ;;  %976 = vadd.xlane.f32.xlu0 %v936_v43  ;;  %v901_v53 = vmax.f32 %v869_v41, 0.0 }
 0x123   : > { %v904_v50 = vmax.f32 %v872_v45, 0.0  ;;  %978 = vadd.xlane.f32.xlu1 %v937_v46  ;;  %v1549_v51 = vpop.f32.mrb[16].mxu1  ;;  %v942_v52 = vmul.f32 %v2176_v11, %v903_v44 }
 0x124   : > { %v1597_v54 = vpop.f32.mrb[16].mxu0  ;;  %v578_v55 = vpop.f32.mrb[17].mxu1  ;;  %v902_v56 = vmax.f32 %v870_v47, 0.0  ;;  %v940_v8 = vmul.f32 %v2176_v11, %v901_v53 }
 0x125   : > { %v796_v57 = vadd.f32 %v1597_v54, %v1549_v51  ;;  %v787_v58 = vpop.f32.mrb[17].mxu0  ;;  %v1550_v59 = vpop.f32.mrb[18].mxu1  ;;  %v943_v62 = vmul.f32 %v2176_v11, %v904_v50 }
 0x126   : > { %v788_v63 = vadd.f32 %v787_v58, %v578_v55  ;;  %v1598_v1 = vpop.f32.mrb[18].mxu0  ;;  %988 = vadd.xlane.f32.xlu0 %v942_v52  ;;  %v581_v2 = vpop.f32.mrb[19].mxu1  ;;  %v941_v12 = vmul.f32 %v2176_v11, %v902_v56 }
 0x127   : > { %v875_v3 = vadd.f32 %v2170_v0, %v796_v57  ;;  %v799_v4 = vadd.f32 %v1598_v1, %v1550_v59  ;;  %v790_v5 = vpop.f32.mrb[19].mxu0  ;;  %990 = vadd.xlane.f32.xlu1 %v943_v62 }
 0x128   : > { %v873_v6 = vadd.f32 %v2170_v0, %v788_v63  ;;  %v791_v7 = vadd.f32 %v790_v5, %v581_v2 }
 0x129   : > { %v907_v9 = vmax.f32 %v875_v3, 0.0  ;;  %v876_v10 = vadd.f32 %v2170_v0, %v799_v4 }
 0x12a   : > { %v874_v14 = vadd.f32 %v2170_v0, %v791_v7  ;;  %984 = vadd.xlane.f32.xlu0 %v940_v8  ;;  %v905_v19 = vmax.f32 %v873_v6, 0.0 }
 0x12b   : > { %v908_v15 = vmax.f32 %v876_v10, 0.0  ;;  %986 = vadd.xlane.f32.xlu1 %v941_v12  ;;  %v1553_v17 = vpop.f32.mrb[20].mxu1  ;;  %v946_v18 = vmul.f32 %v2176_v11, %v907_v9 }
 0x12c   : > { %v1601_v20 = vpop.f32.mrb[20].mxu0  ;;  %v594_v21 = vpop.f32.mrb[21].mxu1  ;;  %v906_v22 = vmax.f32 %v874_v14, 0.0  ;;  %v944_v42 = vmul.f32 %v2176_v11, %v905_v19 }
 0x12d   : > { %v812_v23 = vadd.f32 %v1601_v20, %v1553_v17  ;;  %v803_v26 = vpop.f32.mrb[21].mxu0  ;;  %v1554_v27 = vpop.f32.mrb[22].mxu1  ;;  %v947_v30 = vmul.f32 %v2176_v11, %v908_v15 }
 0x12e   : > { %v804_v31 = vadd.f32 %v803_v26, %v594_v21  ;;  %v1602_v32 = vpop.f32.mrb[22].mxu0  ;;  %996 = vadd.xlane.f32.xlu0 %v946_v18  ;;  %v597_v33 = vpop.f32.mrb[23].mxu1  ;;  %v945_v45 = vmul.f32 %v2176_v11, %v906_v22 }
 0x12f   : > { %v879_v34 = vadd.f32 %v2170_v0, %v812_v23  ;;  %v815_v35 = vadd.f32 %v1602_v32, %v1554_v27  ;;  %v806_v38 = vpop.f32.mrb[23].mxu0  ;;  %998 = vadd.xlane.f32.xlu1 %v947_v30 }
 0x130   : > { %v877_v39 = vadd.f32 %v2170_v0, %v804_v31  ;;  %v807_v41 = vadd.f32 %v806_v38, %v597_v33 }
 0x131   : > { %v911_v43 = vmax.f32 %v879_v34, 0.0  ;;  %v880_v44 = vadd.f32 %v2170_v0, %v815_v35 }
 0x132   : > { %v878_v46 = vadd.f32 %v2170_v0, %v807_v41  ;;  %992 = vadd.xlane.f32.xlu0 %v944_v42  ;;  %v909_v52 = vmax.f32 %v877_v39, 0.0 }
 0x133   : > { %v912_v47 = vmax.f32 %v880_v44, 0.0  ;;  %994 = vadd.xlane.f32.xlu1 %v945_v45  ;;  %v1557_v50 = vpop.f32.mrb[24].mxu1  ;;  %v950_v51 = vmul.f32 %v2176_v11, %v911_v43 }
 0x134   : > { %v1605_v53 = vpop.f32.mrb[24].mxu0  ;;  %v610_v54 = vpop.f32.mrb[25].mxu1  ;;  %v910_v55 = vmax.f32 %v878_v46, 0.0  ;;  %v948_v7 = vmul.f32 %v2176_v11, %v909_v52 }
 0x135   : > { %v828_v56 = vadd.f32 %v1605_v53, %v1557_v50  ;;  %v819_v57 = vpop.f32.mrb[25].mxu0  ;;  %v1558_v58 = vpop.f32.mrb[26].mxu1  ;;  %v951_v59 = vmul.f32 %v2176_v11, %v912_v47 }
 0x136   : > { %v820_v62 = vadd.f32 %v819_v57, %v610_v54  ;;  %v1606_v63 = vpop.f32.mrb[26].mxu0  ;;  %1004 = vadd.xlane.f32.xlu0 %v950_v51  ;;  %v613_v1 = vpop.f32.mrb[27].mxu1  ;;  %v949_v10 = vmul.f32 %v2176_v11, %v910_v55  ;;  %v2241_v55 = vstv %s1024_s14 }
 0x137   : > { %v883_v2 = vadd.f32 %v2170_v0, %v828_v56  ;;  %v831_v3 = vadd.f32 %v1606_v63, %v1558_v58  ;;  %v822_v4 = vpop.f32.mrb[27].mxu0  ;;  %1006 = vadd.xlane.f32.xlu1 %v951_v59 }
 0x138   : > { %v881_v5 = vadd.f32 %v2170_v0, %v820_v62  ;;  %v823_v6 = vadd.f32 %v822_v4, %v613_v1 }
 0x139   : > { %v915_v8 = vmax.f32 %v883_v2, 0.0  ;;  %v884_v9 = vadd.f32 %v2170_v0, %v831_v3 }
 0x13a   : > { %v882_v12 = vadd.f32 %v2170_v0, %v823_v6  ;;  %1000 = vadd.xlane.f32.xlu0 %v948_v7  ;;  %v913_v18 = vmax.f32 %v881_v5, 0.0 }
 0x13b   : > { %v916_v14 = vmax.f32 %v884_v9, 0.0  ;;  %1002 = vadd.xlane.f32.xlu1 %v949_v10  ;;  %v1561_v15 = vpop.f32.mrb[28].mxu1  ;;  %v954_v17 = vmul.f32 %v2176_v11, %v915_v8 }
 0x13c   : > { %v1609_v19 = vpop.f32.mrb[28].mxu0  ;;  %v626_v20 = vpop.f32.mrb[29].mxu1  ;;  %v914_v21 = vmax.f32 %v882_v12, 0.0  ;;  %v952_v41 = vmul.f32 %v2176_v11, %v913_v18 }
 0x13d   : > { %v844_v22 = vadd.f32 %v1609_v19, %v1561_v15  ;;  %v835_v23 = vpop.f32.mrb[29].mxu0  ;;  %v1562_v26 = vpop.f32.mrb[30].mxu1  ;;  %v955_v27 = vmul.f32 %v2176_v11, %v916_v14 }
 0x13e   : > { %v836_v30 = vadd.f32 %v835_v23, %v626_v20  ;;  %v1610_v31 = vpop.f32.mrb[30].mxu0  ;;  %1012 = vadd.xlane.f32.xlu0 %v954_v17  ;;  %v629_v32 = vpop.f32.mrb[31].mxu1  ;;  %v953_v42 = vmul.f32 %v2176_v11, %v914_v21 }
 0x13f   : > { %v847_v33 = vadd.f32 %v1610_v31, %v1562_v26  ;;  %v838_v34 = vpop.f32.mrb[31].mxu0  ;;  %1014 = vadd.xlane.f32.xlu1 %v955_v27  ;;  %v887_v35 = vadd.f32 %v2170_v0, %v844_v22 }
 0x140   : > { %v885_v38 = vadd.f32 %v2170_v0, %v836_v30  ;;  %v839_v39 = vadd.f32 %v838_v34, %v629_v32 }
 0x141   : > { %v888_v44 = vadd.f32 %v2170_v0, %v847_v33  ;;  %v919_v46 = vmax.f32 %v887_v35, 0.0 }
 0x142   : > { %v917_v43 = vmax.f32 %v885_v38, 0.0  ;;  %v886_v45 = vadd.f32 %v2170_v0, %v839_v39  ;;  %1008 = vadd.xlane.f32.xlu0 %v952_v41 }
 0x143   : > { %1010 = vadd.xlane.f32.xlu1 %v953_v42  ;;  %v920_v51 = vmax.f32 %v888_v44, 0.0  ;;  %v958_v53 = vmul.f32 %v2176_v11, %v919_v46 }
 0x144   : > { %v918_v47 = vmax.f32 %v886_v45, 0.0  ;;  %v956_v50 = vmul.f32 %v2176_v11, %v917_v43 }
 0x145   : > { %v959_v54 = vmul.f32 %v2176_v11, %v920_v51 }
 0x146   : > { %1016 = vadd.xlane.f32.xlu0 %v956_v50  ;;  %v957_v52 = vmul.f32 %v2176_v11, %v918_v47 }
 0x148   : > { %1018 = vadd.xlane.f32.xlu1 %v957_v52 }
 0x14a   : > { %1020 = vadd.xlane.f32.xlu0 %v958_v53 }
 0x14c   : > { %1022 = vadd.xlane.f32.xlu1 %v959_v54 }
 0x19a   : > { %v965_v0 = vpop.xlane.xlu1 %964 }
 0x19b   : > { %v1028_v56 = vadd.f32 %v2241_v55, %v965_v0  ;;  %v961_v57 = vpop.xlane.xlu0 %960 }
 0x19c   : > { %v1026_v58 = vadd.f32 %v2241_v55, %v961_v57 }
 0x19d   : > { %v1431_v59 = vmul.f32 -1.442695, %v1028_v56 }
 0x19e   : > { %v1429_v62 = vmul.f32 -1.442695, %v1026_v58  ;;  %v967_v63 = vpop.xlane.xlu1 %966 }
 0x19f   : > { %1700 = vpow2.f32 %v1431_v59  ;;  %v1029_v1 = vadd.f32 %v2241_v55, %v967_v63  ;;  %v963_v2 = vpop.xlane.xlu0 %962 }
 0x1a0   : > { %1702 = vpow2.f32 %v1429_v62  ;;  %v1027_v11 = vadd.f32 %v2241_v55, %v963_v2 }
 0x1a1   : > { %v1432_v3 = vmul.f32 -1.442695, %v1029_v1 }
 0x1a2   : > { %v1430_v4 = vmul.f32 -1.442695, %v1027_v11 }
 0x1a3   : > { %1704 = vpow2.f32 %v1432_v3  ;;  %v973_v5 = vpop.xlane.xlu0 %972 }
 0x1a4   : > { %1706 = vpow2.f32 %v1430_v4  ;;  %v1032_v6 = vadd.f32 %v2241_v55, %v973_v5  ;;  %v975_v7 = vpop.xlane.xlu1 %974 }
 0x1a5   : > { %v1033_v8 = vadd.f32 %v2241_v55, %v975_v7 }
 0x1a6   : > { %v1435_v9 = vmul.f32 -1.442695, %v1032_v6 }
 0x1a7   : > { %v1436_v10 = vmul.f32 -1.442695, %v1033_v8  ;;  %v969_v12 = vpop.xlane.xlu0 %968 }
 0x1a8   : > { %1708 = vpow2.f32 %v1435_v9  ;;  %v1030_v14 = vadd.f32 %v2241_v55, %v969_v12  ;;  %v971_v15 = vpop.xlane.xlu1 %970 }
 0x1a9   : > { %v1701_v17 = vpop.eup %1700  ;;  %1710 = vpow2.f32 %v1436_v10  ;;  %v1031_v18 = vadd.f32 %v2241_v55, %v971_v15 }
 0x1aa   : > { %v1703_v19 = vpop.eup %1702  ;;  %v1156_v20 = vadd.f32 1.0, %v1701_v17  ;;  %v1433_v21 = vmul.f32 -1.442695, %v1030_v14 }
 0x1ab   : > { %v1154_v22 = vadd.f32 1.0, %v1703_v19  ;;  %v1434_v23 = vmul.f32 -1.442695, %v1031_v18  ;;  %v981_v26 = vpop.xlane.xlu0 %980 }
 0x1ac   : > { %1712 = vrcp.f32 %v1156_v20  ;;  %v1036_v27 = vadd.f32 %v2241_v55, %v981_v26  ;;  %v983_v30 = vpop.xlane.xlu1 %982 }
 0x1ad   : > { %v1705_v31 = vpop.eup %1704  ;;  %1714 = vrcp.f32 %v1154_v22  ;;  %v1037_v32 = vadd.f32 %v2241_v55, %v983_v30 }
 0x1ae   : > { %v1707_v33 = vpop.eup %1706  ;;  %v1157_v34 = vadd.f32 1.0, %v1705_v31  ;;  %1716 = vpow2.f32 %v1433_v21  ;;  %v1439_v35 = vmul.f32 -1.442695, %v1036_v27 }
 0x1af   : > { %v1155_v38 = vadd.f32 1.0, %v1707_v33  ;;  %1718 = vpow2.f32 %v1434_v23  ;;  %v1440_v39 = vmul.f32 -1.442695, %v1037_v32  ;;  %v977_v41 = vpop.xlane.xlu0 %976 }
 0x1b0   : > { %1720 = vrcp.f32 %v1157_v34  ;;  %v1034_v42 = vadd.f32 %v2241_v55, %v977_v41  ;;  %v979_v43 = vpop.xlane.xlu1 %978 }
 0x1b1   : > { %1722 = vrcp.f32 %v1155_v38  ;;  %v1035_v44 = vadd.f32 %v2241_v55, %v979_v43 }
 0x1b2   : > { %v1709_v45 = vpop.eup %1708  ;;  %1724 = vpow2.f32 %v1439_v35  ;;  %v1437_v46 = vmul.f32 -1.442695, %v1034_v42 }
 0x1b3   : > { %v1711_v47 = vpop.eup %1710  ;;  %v1160_v50 = vadd.f32 1.0, %v1709_v45  ;;  %1726 = vpow2.f32 %v1440_v39  ;;  %v1438_v51 = vmul.f32 -1.442695, %v1035_v44  ;;  %v989_v52 = vpop.xlane.xlu0 %988 }
 0x1b4   : > { %v1161_v53 = vadd.f32 1.0, %v1711_v47  ;;  %1728 = vpow2.f32 %v1437_v46  ;;  %v1040_v54 = vadd.f32 %v2241_v55, %v989_v52  ;;  %v991_v0 = vpop.xlane.xlu1 %990 }
 0x1b5   : > { %1730 = vrcp.f32 %v1160_v50  ;;  %v1041_v56 = vadd.f32 %v2241_v55, %v991_v0 }
 0x1b6   : > { %v1713_v57 = vpop.eup %1712  ;;  %1732 = vrcp.f32 %v1161_v53  ;;  %v1443_v58 = vmul.f32 -1.442695, %v1040_v54 }
 0x1b7   : > { %v1715_v59 = vpop.eup %1714  ;;  %v1252_v62 = vmul.f32 %v1713_v57, %v2077_v24  ;;  %1734 = vpow2.f32 %v1438_v51  ;;  %v1444_v63 = vmul.f32 -1.442695, %v1041_v56  ;;  %v985_v1 = vpop.xlane.xlu0 %984 }
 0x1b8   : > { %v1717_v2 = vpop.eup %1716  ;;  %v1250_v11 = vmul.f32 %v1715_v59, %v2052_v13  ;;  %1736 = vpow2.f32 %v1443_v58  ;;  %v1038_v3 = vadd.f32 %v2241_v55, %v985_v1  ;;  %v987_v4 = vpop.xlane.xlu1 %986 }
 0x1b9   : > { %v1719_v5 = vpop.eup %1718  ;;  %1284 = vst [vmem:[%s2263_s18 + $0x10] sm:$0xff] %v1252_v62  ;;  %v1158_v6 = vadd.f32 1.0, %v1717_v2  ;;  %1738 = vpow2.f32 %v1444_v63  ;;  %v1039_v24 = vadd.f32 %v2241_v55, %v987_v4 }
 0x1ba   : > { %v1721_v7 = vpop.eup %1720  ;;  %1282 = vst [vmem:[%s2263_s18] sm:$0xff] %v1250_v11  ;;  %v1159_v8 = vadd.f32 1.0, %v1719_v5  ;;  %v1441_v9 = vmul.f32 -1.442695, %v1038_v3 }
 0x1bb   : > { %v1723_v13 = vpop.eup %1722  ;;  %v1253_v10 = vmul.f32 %v1721_v7, %v2080_v25  ;;  %1740 = vrcp.f32 %v1158_v6  ;;  %v1442_v12 = vmul.f32 -1.442695, %v1039_v24  ;;  %v997_v14 = vpop.xlane.xlu0 %996 }
 0x1bc   : > { %v1725_v15 = vpop.eup %1724  ;;  %v1251_v17 = vmul.f32 %v1723_v13, %v2058_v16  ;;  %1742 = vrcp.f32 %v1159_v8  ;;  %v1044_v18 = vadd.f32 %v2241_v55, %v997_v14  ;;  %v999_v19 = vpop.xlane.xlu1 %998 }
 0x1bd   : > { %v1727_v20 = vpop.eup %1726  ;;  %1285 = vst [vmem:[%s2263_s18 + $0x18] sm:$0xff] %v1253_v10  ;;  %v1164_v21 = vadd.f32 1.0, %v1725_v15  ;;  %1744 = vpow2.f32 %v1441_v9  ;;  %v1045_v22 = vadd.f32 %v2241_v55, %v999_v19 }
 0x1be   : > { %v1729_v23 = vpop.eup %1728  ;;  %1283 = vst [vmem:[%s2263_s18 + $0x8] sm:$0xff] %v1251_v17  ;;  %v1165_v26 = vadd.f32 1.0, %v1727_v20  ;;  %1746 = vpow2.f32 %v1442_v12  ;;  %v1447_v25 = vmul.f32 -1.442695, %v1044_v18 }
 0x1bf   : > { %v1731_v27 = vpop.eup %1730  ;;  %1748 = vrcp.f32 %v1164_v21  ;;  %v1162_v30 = vadd.f32 1.0, %v1729_v23  ;;  %v1448_v16 = vmul.f32 -1.442695, %v1045_v22  ;;  %v993_v31 = vpop.xlane.xlu0 %992  ;;  %v1828_v21 = vld [vmem:[%s2044_s16 + $0x48] sm:$0xff] }
 0x1c0   : > { %v1733_v32 = vpop.eup %1732  ;;  %v1256_v33 = vmul.f32 %v1731_v27, %v2097_v36  ;;  %1750 = vrcp.f32 %v1165_v26  ;;  %v1042_v34 = vadd.f32 %v2241_v55, %v993_v31  ;;  %v995_v35 = vpop.xlane.xlu1 %994 }
 0x1c1   : > { %v1735_v38 = vpop.eup %1734  ;;  %v1257_v39 = vmul.f32 %v1733_v32, %v2100_v37  ;;  %1752 = vrcp.f32 %v1162_v30  ;;  %v1043_v41 = vadd.f32 %v2241_v55, %v995_v35 }
 0x1c2   : > { %v1737_v42 = vpop.eup %1736  ;;  %1288 = vst [vmem:[%s2263_s18 + $0x30] sm:$0xff] %v1256_v33  ;;  %v1163_v43 = vadd.f32 1.0, %v1735_v38  ;;  %1754 = vpow2.f32 %v1447_v25  ;;  %v1445_v46 = vmul.f32 -1.442695, %v1042_v34 }
 0x1c3   : > { %v1739_v44 = vpop.eup %1738  ;;  %1289 = vst [vmem:[%s2263_s18 + $0x38] sm:$0xff] %v1257_v39  ;;  %v1168_v45 = vadd.f32 1.0, %v1737_v42  ;;  %1756 = vpow2.f32 %v1448_v16  ;;  %v1005_v36 = vpop.xlane.xlu0 %1004  ;;  %v1446_v50 = vmul.f32 -1.442695, %v1043_v41 }
 0x1c4   : > { %1758 = vrcp.f32 %v1163_v43  ;;  %v1169_v47 = vadd.f32 1.0, %v1739_v44  ;;  %v1048_v51 = vadd.f32 %v2241_v55, %v1005_v36  ;;  %v1007_v37 = vpop.xlane.xlu1 %1006 }
 0x1c5   : > { %v1741_v52 = vpop.eup %1740  ;;  %1760 = vrcp.f32 %v1168_v45  ;;  %v1049_v53 = vadd.f32 %v2241_v55, %v1007_v37  ;;  %v1829_v45 = vld [vmem:[%s2044_s16 + $0x60] sm:$0xff] }
 0x1c6   : > { %v1743_v54 = vpop.eup %1742  ;;  %v1254_v0 = vmul.f32 %v1741_v52, %v2085_v28  ;;  %1762 = vrcp.f32 %v1169_v47  ;;  %v1451_v56 = vmul.f32 -1.442695, %v1048_v51 }
 0x1c7   : > { %v1745_v57 = vpop.eup %1744  ;;  %v1255_v58 = vmul.f32 %v1743_v54, %v2088_v29  ;;  %1764 = vpow2.f32 %v1445_v46  ;;  %v1001_v59 = vpop.xlane.xlu0 %1000  ;;  %v1452_v1 = vmul.f32 -1.442695, %v1049_v53 }
 0x1c8   : > { %v1747_v62 = vpop.eup %1746  ;;  %1286 = vst [vmem:[%s2263_s18 + $0x20] sm:$0xff] %v1254_v0  ;;  %v1166_v63 = vadd.f32 1.0, %v1745_v57  ;;  %1766 = vpow2.f32 %v1446_v50  ;;  %v1046_v2 = vadd.f32 %v2241_v55, %v1001_v59  ;;  %v1003_v11 = vpop.xlane.xlu1 %1002  ;;  %v1830_v50 = vld [vmem:[%s2044_s16 + $0x68] sm:$0xff] }
 0x1c9   : > { %v1749_v3 = vpop.eup %1748  ;;  %1287 = vst [vmem:[%s2263_s18 + $0x28] sm:$0xff] %v1255_v58  ;;  %v1167_v4 = vadd.f32 1.0, %v1747_v62  ;;  %1768 = vpow2.f32 %v1451_v56  ;;  %v1047_v28 = vadd.f32 %v2241_v55, %v1003_v11  ;;  %v1831_v11 = vld [vmem:[%s2044_s16 + $0x90] sm:$0xff] }
 0x1ca   : > { %v1751_v5 = vpop.eup %1750  ;;  %v1260_v29 = vmul.f32 %v1749_v3, %v2114_v48  ;;  %1770 = vrcp.f32 %v1166_v63  ;;  %v1449_v6 = vmul.f32 -1.442695, %v1046_v2 }
 0x1cb   : > { %v1753_v24 = vpop.eup %1752  ;;  %v1261_v7 = vmul.f32 %v1751_v5, %v2117_v49  ;;  %1772 = vrcp.f32 %v1167_v4  ;;  %v1450_v8 = vmul.f32 -1.442695, %v1047_v28  ;;  %v1013_v9 = vpop.xlane.xlu0 %1012  ;;  %v1832_v5 = vld [vmem:[%s2044_s16 + $0x98] sm:$0xff] }
 0x1cc   : > { %v1755_v13 = vpop.eup %1754  ;;  %1292 = vst [vmem:[%s2263_s18 + $0x50] sm:$0xff] %v1260_v29  ;;  %v1258_v10 = vmul.f32 %v1753_v24, %v2105_v40  ;;  %1774 = vpow2.f32 %v1452_v1  ;;  %v1052_v12 = vadd.f32 %v2241_v55, %v1013_v9  ;;  %v1015_v14 = vpop.xlane.xlu1 %1014 }
 0x1cd   : > { %v1757_v15 = vpop.eup %1756  ;;  %1293 = vst [vmem:[%s2263_s18 + $0x58] sm:$0xff] %v1261_v7  ;;  %v1172_v48 = vadd.f32 1.0, %v1755_v13  ;;  %1776 = vpow2.f32 %v1449_v6  ;;  %v1053_v17 = vadd.f32 %v2241_v55, %v1015_v14 }
 0x1ce   : > { %v1759_v49 = vpop.eup %1758  ;;  %1290 = vst [vmem:[%s2263_s18 + $0x40] sm:$0xff] %v1258_v10  ;;  %v1173_v18 = vadd.f32 1.0, %v1757_v15  ;;  %1778 = vpow2.f32 %v1450_v8  ;;  %v1455_v19 = vmul.f32 -1.442695, %v1052_v12  ;;  %v1833_v10 = vld [vmem:[%s2044_s16 + $0x80] sm:$0xff]  ;;  %v1834_v15 = vld [vmem:[%s2044_s16 + $0x88] sm:$0xff] }
 0x1cf   : > { %v1761_v20 = vpop.eup %1760  ;;  %v1259_v40 = vmul.f32 %v1828_v21, %v1759_v49  ;;  %1780 = vrcp.f32 %v1172_v48  ;;  %v1456_v22 = vmul.f32 -1.442695, %v1053_v17  ;;  %v1009_v23 = vpop.xlane.xlu0 %1008  ;;  %v1835_v49 = vld [vmem:[%s2044_s16 + $0xb0] sm:$0xff] }
 0x1d0   : > { %v1763_v26 = vpop.eup %1762  ;;  %v1264_v25 = vmul.f32 %v1761_v20, %v2128_v60  ;;  %1782 = vrcp.f32 %v1173_v18  ;;  %v1050_v27 = vadd.f32 %v2241_v55, %v1009_v23  ;;  %v1011_v30 = vpop.xlane.xlu1 %1010  ;;  %v1836_v23 = vld [vmem:[%s2044_s16 + $0xb8] sm:$0xff] }
 0x1d1   : > { %v1765_v16 = vpop.eup %1764  ;;  %1291 = vst [vmem:[%s2263_s18 + $0x48] sm:$0xff] %v1259_v40  ;;  %v1265_v31 = vmul.f32 %v1763_v26, %v2131_v61  ;;  %1784 = vpow2.f32 %v1455_v19  ;;  %v1051_v32 = vadd.f32 %v2241_v55, %v1011_v30 }
 0x1d2   : > { %v1767_v33 = vpop.eup %1766  ;;  %1296 = vst [vmem:[%s2263_s18 + $0x70] sm:$0xff] %v1264_v25  ;;  %v1170_v34 = vadd.f32 1.0, %v1765_v16  ;;  %1786 = vpow2.f32 %v1456_v22  ;;  %v1453_v38 = vmul.f32 -1.442695, %v1050_v27  ;;  %v1837_v27 = vld [vmem:[%s2044_s16 + $0xa0] sm:$0xff] }
 0x1d3   : > { %v1769_v35 = vpop.eup %1768  ;;  %1297 = vst [vmem:[%s2263_s18 + $0x78] sm:$0xff] %v1265_v31  ;;  %v1171_v60 = vadd.f32 1.0, %v1767_v33  ;;  %v1017_v39 = vpop.xlane.xlu0 %1016  ;;  %v1454_v43 = vmul.f32 -1.442695, %v1051_v32  ;;  %v1838_v31 = vld [vmem:[%s2044_s16 + $0xa8] sm:$0xff] }
 0x1d4   : > { %v1771_v41 = vpop.eup %1770  ;;  %1788 = vrcp.f32 %v1170_v34  ;;  %v1176_v42 = vadd.f32 1.0, %v1769_v35  ;;  %v1054_v61 = vadd.f32 %v2241_v55, %v1017_v39  ;;  %v1839_v39 = vld [vmem:[%s2044_s16 + $0xd0] sm:$0xff] }
 0x1d5   : > { %v1773_v44 = vpop.eup %1772  ;;  %v1262_v46 = vmul.f32 %v1829_v45, %v1771_v41  ;;  %1790 = vrcp.f32 %v1171_v60  ;;  %v1019_v36 = vpop.xlane.xlu1 %1018 }
 0x1d6   : > { %v1775_v47 = vpop.eup %1774  ;;  %v1263_v51 = vmul.f32 %v1830_v50, %v1773_v44  ;;  %1792 = vrcp.f32 %v1176_v42  ;;  %v1055_v37 = vadd.f32 %v2241_v55, %v1019_v36  ;;  %v1457_v57 = vmul.f32 -1.442695, %v1054_v61  ;;  %v1841_v50 = vld [vmem:[%s2044_s16 + $0xc0] sm:$0xff] }
 0x1d7   : > { %v1777_v52 = vpop.eup %1776  ;;  %1294 = vst [vmem:[%s2263_s18 + $0x60] sm:$0xff] %v1262_v46  ;;  %v1177_v53 = vadd.f32 1.0, %v1775_v47  ;;  %1794 = vpow2.f32 %v1453_v38  ;;  %v1021_v54 = vpop.xlane.xlu0 %1020 }
 0x1d8   : > { %v1779_v0 = vpop.eup %1778  ;;  %1295 = vst [vmem:[%s2263_s18 + $0x68] sm:$0xff] %v1263_v51  ;;  %v1174_v56 = vadd.f32 1.0, %v1777_v52  ;;  %1796 = vpow2.f32 %v1454_v43  ;;  %v1056_v58 = vadd.f32 %v2241_v55, %v1021_v54  ;;  %v1458_v63 = vmul.f32 -1.442695, %v1055_v37  ;;  %v1840_v43 = vld [vmem:[%s2044_s16 + $0xd8] sm:$0xff]  ;;  %v1842_v37 = vld [vmem:[%s2044_s16 + $0xc8] sm:$0xff] }
 0x1d9   : > { %v1781_v59 = vpop.eup %1780  ;;  %1798 = vrcp.f32 %v1177_v53  ;;  %v1175_v62 = vadd.f32 1.0, %v1779_v0  ;;  %v1023_v1 = vpop.xlane.xlu1 %1022  ;;  %v1843_v0 = vld [vmem:[%s2044_s16 + $0xe0] sm:$0xff] }
 0x1da   : > { %v1783_v2 = vpop.eup %1782  ;;  %v1268_v3 = vmul.f32 %v1831_v11, %v1781_v59  ;;  %1800 = vrcp.f32 %v1174_v56  ;;  %v1057_v4 = vadd.f32 %v2241_v55, %v1023_v1  ;;  %v1459_v7 = vmul.f32 -1.442695, %v1056_v58 }
 0x1db   : > { %v1785_v28 = vpop.eup %1784  ;;  %v1269_v29 = vmul.f32 %v1832_v5, %v1783_v2  ;;  %1802 = vrcp.f32 %v1175_v62  ;;  %v1846_v2 = vld [vmem:[%s2044_s16 + $0xf8] sm:$0xff] }
 0x1dc   : > { %v1787_v6 = vpop.eup %1786  ;;  %1300 = vst [vmem:[%s2263_s18 + $0x90] sm:$0xff] %v1268_v3  ;;  %v1180_v24 = vadd.f32 1.0, %v1785_v28  ;;  %1804 = vpow2.f32 %v1457_v57  ;;  %v1460_v9 = vmul.f32 -1.442695, %v1057_v4  ;;  %v1844_v57 = vld [vmem:[%s2044_s16 + $0xe8] sm:$0xff] }
 0x1dd   : > { %1301 = vst [vmem:[%s2263_s18 + $0x98] sm:$0xff] %v1269_v29  ;;  %v1181_v8 = vadd.f32 1.0, %v1787_v6  ;;  %1806 = vpow2.f32 %v1458_v63  ;;  %v1845_v63 = vld [vmem:[%s2044_s16 + $0xf0] sm:$0xff] }
 0x1de   : > { %v1789_v13 = vpop.eup %1788  ;;  %1808 = vrcp.f32 %v1180_v24 }
 0x1df   : > { %v1791_v55 = vpop.eup %1790  ;;  %v1266_v12 = vmul.f32 %v1833_v10, %v1789_v13  ;;  %1810 = vrcp.f32 %v1181_v8 }
 0x1e0   : > { %v1793_v14 = vpop.eup %1792  ;;  %v1267_v48 = vmul.f32 %v1834_v15, %v1791_v55  ;;  %1812 = vpow2.f32 %v1459_v7 }
 0x1e1   : > { %v1795_v17 = vpop.eup %1794  ;;  %1298 = vst [vmem:[%s2263_s18 + $0x80] sm:$0xff] %v1266_v12  ;;  %v1272_v18 = vmul.f32 %v1835_v49, %v1793_v14  ;;  %1814 = vpow2.f32 %v1460_v9 }
 0x1e2   : > { %v1797_v19 = vpop.eup %1796  ;;  %1299 = vst [vmem:[%s2263_s18 + $0x88] sm:$0xff] %v1267_v48  ;;  %v1178_v20 = vadd.f32 1.0, %v1795_v17 }
 0x1e3   : > { %v1799_v21 = vpop.eup %1798  ;;  %1304 = vst [vmem:[%s2263_s18 + $0xb0] sm:$0xff] %v1272_v18  ;;  %v1179_v40 = vadd.f32 1.0, %v1797_v19 }
 0x1e4   : > { %v1801_v22 = vpop.eup %1800  ;;  %v1273_v26 = vmul.f32 %v1836_v23, %v1799_v21  ;;  %1816 = vrcp.f32 %v1178_v20 }
 0x1e5   : > { %v1803_v25 = vpop.eup %1802  ;;  %v1270_v30 = vmul.f32 %v1837_v27, %v1801_v22  ;;  %1818 = vrcp.f32 %v1179_v40 }
 0x1e6   : > { %v1805_v16 = vpop.eup %1804  ;;  %1305 = vst [vmem:[%s2263_s18 + $0xb8] sm:$0xff] %v1273_v26  ;;  %v1271_v32 = vmul.f32 %v1838_v31, %v1803_v25 }
 0x1e7   : > { %v1807_v33 = vpop.eup %1806  ;;  %1302 = vst [vmem:[%s2263_s18 + $0xa0] sm:$0xff] %v1270_v30  ;;  %v1182_v34 = vadd.f32 1.0, %v1805_v16 }
 0x1e8   : > { %v1809_v35 = vpop.eup %1808  ;;  %1303 = vst [vmem:[%s2263_s18 + $0xa8] sm:$0xff] %v1271_v32  ;;  %v1183_v60 = vadd.f32 1.0, %v1807_v33 }
 0x1e9   : > { %v1811_v38 = vpop.eup %1810  ;;  %v1276_v41 = vmul.f32 %v1839_v39, %v1809_v35  ;;  %1820 = vrcp.f32 %v1182_v34 }
 0x1ea   : > { %v1813_v42 = vpop.eup %1812  ;;  %v1277_v61 = vmul.f32 %v1840_v43, %v1811_v38  ;;  %1822 = vrcp.f32 %v1183_v60 }
 0x1eb   : > { %v1815_v44 = vpop.eup %1814  ;;  %1308 = vst [vmem:[%s2263_s18 + $0xd0] sm:$0xff] %v1276_v41  ;;  %v1184_v45 = vadd.f32 1.0, %v1813_v42 }
 0x1ec   : > { %1309 = vst [vmem:[%s2263_s18 + $0xd8] sm:$0xff] %v1277_v61  ;;  %v1185_v46 = vadd.f32 1.0, %v1815_v44 }
 0x1ed   : > { %1824 = vrcp.f32 %v1184_v45 }
 0x1ee   : > { %v1817_v36 = vpop.eup %1816  ;;  %1826 = vrcp.f32 %v1185_v46 }
 0x1ef   : > { %v1819_v47 = vpop.eup %1818  ;;  %v1274_v51 = vmul.f32 %v1841_v50, %v1817_v36 }
 0x1f0   : > { %v1275_v52 = vmul.f32 %v1842_v37, %v1819_v47 }
 0x1f1   : > { %1306 = vst [vmem:[%s2263_s18 + $0xc0] sm:$0xff] %v1274_v51 }
 0x1f2   : > { %1307 = vst [vmem:[%s2263_s18 + $0xc8] sm:$0xff] %v1275_v52 }
 0x1f3   : > { %v1821_v53 = vpop.eup %1820 }
 0x1f4   : > { %v1823_v54 = vpop.eup %1822  ;;  %v1278_v56 = vmul.f32 %v1843_v0, %v1821_v53 }
 0x1f5   : > { %v1279_v58 = vmul.f32 %v1844_v57, %v1823_v54 }
 0x1f6   : > { %1310 = vst [vmem:[%s2263_s18 + $0xe0] sm:$0xff] %v1278_v56 }
 0x1f7   : > { %v1825_v59 = vpop.eup %1824  ;;  %1311 = vst [vmem:[%s2263_s18 + $0xe8] sm:$0xff] %v1279_v58 }
 0x1f8   : > { %v1827_v62 = vpop.eup %1826  ;;  %v1280_v1 = vmul.f32 %v1845_v63, %v1825_v59 }
 0x1f9   : > { %v1281_v11 = vmul.f32 %v1846_v2, %v1827_v62 }
 0x1fa   : > { %1312 = vst [vmem:[%s2263_s18 + $0xf0] sm:$0xff] %v1280_v1 }
 0x1fb   : > { %1313 = vst [vmem:[%s2263_s18 + $0xf8] sm:$0xff] %v1281_v11 }
 0x1fc   : > { %1860 = shalt.err (!%p1857_p3)
}
 0x1fd   : > { %s1861_s16 = scalar_lea.hbm %s2346_s23, 4096  ;;  %s1865_s15 = scalar_lea.hbm %s2403_s7, 8192 }
 0x1fe   : > { %p1862_p4 = scmp.ne.s32.totalorder %s2346_s23, %s1861_s16  ;;  %p1866_p9 = scmp.lt.u32.totalorder %s2346_s23, %s2403_s7 }
 0x1ff   : > { %p1867_p10 = scmp.lt.u32.totalorder %s1865_s15, %s1861_s16  ;;  %p1869_p12 = scmp.lt.u32.totalorder %s1861_s16, %s2346_s23 }
 0x200   : > { %p1863_p7 = pnand %p1862_p4, %p1995_p5 }
 0x201   : > { %p1868_p11 = por %p1867_p10, %p1866_p9 }
 0x202   : > { %p1864_p8 = pneg %p1863_p7 }
 0x203   : > { %p1870_p13 = por %p1869_p12, %p1868_p11 }
 0x205   : > { %p1871_p0 = pnand %p1870_p13, %p1864_p8 }
 0x207   : > { %1874 = shalt.err (!%p1871_p0)
}
 0x208   : > { %s1912_s19 = smov 128   ;;  %s1913_s21 = smov 8  }
 0x209   : > { %1643 = dma.vmem_to_hbm [thread:$0]  (%p1995_p5), %s2348_s20, 4096, %s2346_s23, %s2355_s6, %s1912_s19, %s1912_s19, %s1913_s21  }
 0x20a PF: > { %p1649_p1 = scmp.ge.s32.totalorder %s1909_s29, 2  ;;  %s1343_s22 = sand.u32 1, %s1897_s26  }
 0x20b   : > { %s1344_s25 = scalar_lea.sflag [#allocation4], %s1343_s22 }
 0x20c   : > { %p1646_p2 = pnand %p1649_p1, %p1999_p6 }
 0x20e   : > { %1892 = dma.done.wait (!%p1646_p2), %s1344_s25, 4096  }
 0x20f   : > { %1894 = vsyncadd (!%p1646_p2), %s1344_s25, 4294963200  ;;  %p18_p3 = scmp.ge.s32.totalorder %s1982_s8, 4   ;;  %s2406_s26 = smov %s1901_s27 }
 0x210   : > { %s2407_s27 = smov %s1905_s28  ;;  %s2408_s28 = smov %s1993_s11 }
 0x211   : > { %s2409_s29 = smov %s1982_s8  ;;  %20 = sbr.rel (!%p18_p3) target bundleno = 5 (0x5), region = 86 }
 0x218   :  { %1349 = vsyncpa [#allocation4], 1 }
 0x219   :  { %1351 = vsyncpa [#allocation4 + $0x1], 1 }

</bundles_post_ra>
